<compile_context>
chip_gen: v6e
topology: v6e:2x2x1
jax: 0.10.0
libtpu: 0.0.40
codegen_flags: <defaults>
</compile_context>

<pallas_src>
import jax
import jax.numpy as jnp
from jax.experimental import pallas as pl
from jax.experimental.pallas import tpu as pltpu

THRESHOLD = 1.0  # snn.Leaky default threshold
_LANE = 128
_SUBLANE = 8


def _round_up(x, m):
    return (x + m - 1) // m * m


def fcsnn_kernel(x_ref, w1_ref, b1_ref, w2_ref, b2_ref, spk2_ref, mem2_ref):
    # fc1: cur1 = x @ W1 + b1  (bf16 MXU inputs, f32 accumulate).
    cur1 = jnp.dot(x_ref[...], w1_ref[...], preferred_element_type=jnp.float32)
    mem1 = cur1 + b1_ref[...]  # zero initial membrane => mem1 == cur1

    # LIF1: Heaviside(mem1 - threshold). Spikes are exactly 0/1 -> bf16 is exact
    # and feeds the second MXU matmul at full rate.
    spk1 = (mem1 > THRESHOLD).astype(jnp.bfloat16)

    # fc2: cur2 = spk1 @ W2 + b2
    cur2 = jnp.dot(spk1, w2_ref[...], preferred_element_type=jnp.float32)
    mem2 = cur2 + b2_ref[...]  # zero initial membrane => mem2 == cur2

    # LIF2
    spk2_ref[...] = (mem2 > THRESHOLD).astype(spk2_ref.dtype)
    mem2_ref[...] = mem2.astype(mem2_ref.dtype)


def _pick_tm(batch):
    if batch >= 512:
        return 512
    if batch >= 128:
        return 128
    return _round_up(batch, _SUBLANE)


def fcsnn_forward(x, w1, b1, w2, b2, beta=0.9):
    """Single-step fcSNN forward.

    x:  (B, in_features) float32
    w1: (in_features, n_hidden)  (already transposed vs. nn.Linear storage)
    w2: (n_hidden, n_out)
    Returns (spk2, mem2), each (B, n_out) float32.
    """
    del beta  # no-op for a single step from a zero membrane (see module note)

    B, in_features = x.shape
    n_hidden = w1.shape[1]
    n_out = w2.shape[1]

    kp = _round_up(in_features, _LANE)   # padded K
    hp = _round_up(n_hidden, _LANE)      # padded hidden
    npad = _round_up(n_out, _LANE)       # padded output (lane-dense stores)
    tm = _pick_tm(B)                     # batch tile (multiple of 8)
    bp = _round_up(B, tm)                # padded batch
    grid = (bp // tm,)

    # Zero-pad + cast once in the wrapper. Padding is numerically inert:
    # zero weight rows/cols and zero biases keep padded units silent.
    x_p = jnp.zeros((bp, kp), jnp.bfloat16).at[:B, :in_features].set(
        x.astype(jnp.bfloat16))
    w1_p = jnp.zeros((kp, hp), jnp.bfloat16).at[:in_features, :n_hidden].set(
        w1.astype(jnp.bfloat16))
    w2_p = jnp.zeros((hp, npad), jnp.bfloat16).at[:n_hidden, :n_out].set(
        w2.astype(jnp.bfloat16))
    b1_p = jnp.zeros((1, hp), jnp.float32).at[0, :n_hidden].set(
        b1.astype(jnp.float32))
    b2_p = jnp.zeros((1, npad), jnp.float32).at[0, :n_out].set(
        b2.astype(jnp.float32))

    bf16, f32 = 2, 4
    # VMEM budget: double-buffered x tile + resident weights/biases (counted at
    # 2x for safety) + double-buffered f32 outputs; sized to fit v7x's 32 MiB
    # scoped / 64 MiB physical VMEM with headroom.
    vmem_bytes = (
        2 * tm * kp * bf16
        + 2 * (kp * hp + hp * npad) * bf16
        + 2 * (hp + npad) * f32
        + 2 * 2 * tm * npad * f32
    )
    vmem_limit = min(2 * vmem_bytes + (1 << 20), 32 * 1024 * 1024)

    cost = pl.CostEstimate(
        flops=2 * bp * (kp * hp + hp * npad),
        transcendentals=0,
        bytes_accessed=(
            bp * kp * bf16
            + (kp * hp + hp * npad) * bf16
            + (hp + npad) * f32
            + 2 * bp * npad * f32
        ),
    )

    spk2_p, mem2_p = pl.pallas_call(
        fcsnn_kernel,
        out_shape=(
            jax.ShapeDtypeStruct((bp, npad), jnp.float32),
            jax.ShapeDtypeStruct((bp, npad), jnp.float32),
        ),
        grid=grid,
        in_specs=[
            pl.BlockSpec((tm, kp), lambda i: (i, 0)),     # x: tiled over batch
            pl.BlockSpec((kp, hp), lambda i: (0, 0)),     # W1: VMEM-resident
            pl.BlockSpec((1, hp), lambda i: (0, 0)),      # b1: VMEM-resident
            pl.BlockSpec((hp, npad), lambda i: (0, 0)),   # W2: VMEM-resident
            pl.BlockSpec((1, npad), lambda i: (0, 0)),    # b2: VMEM-resident
        ],
        out_specs=(
            pl.BlockSpec((tm, npad), lambda i: (i, 0)),
            pl.BlockSpec((tm, npad), lambda i: (i, 0)),
        ),
        compiler_params=pltpu.CompilerParams(
            dimension_semantics=("parallel",),  # shard batch across v7x's 2 TCs
            vmem_limit_bytes=vmem_limit,
        ),
        cost_estimate=cost,
    )(x_p, w1_p, b1_p, w2_p, b2_p)

    return spk2_p[:B, :n_out], mem2_p[:B, :n_out]


def init_linear_params(key, in_features, out_features):
    """Deterministic init mimicking nn.Linear's U(-1/sqrt(fan_in), 1/sqrt(fan_in))."""
    kw, kb = jax.random.split(key)
    bound = 1.0 / jnp.sqrt(jnp.float32(in_features))
    # Stored already transposed: (in_features, out_features)
    w = jax.random.uniform(kw, (in_features, out_features), jnp.float32, -bound, bound)
    b = jax.random.uniform(kb, (out_features,), jnp.float32, -bound, bound)
    return w, b


if __name__ == "__main__":
    # Small shapes consistent with a fully-connected SNN classifier.
    batch = 2
    in_features = 64
    n_hidden = 32
    n_out = 10
    beta = 0.9

    key = jax.random.PRNGKey(0)
    kx, k1, k2 = jax.random.split(key, 3)

    x = jax.random.normal(kx, (batch, in_features), jnp.float32)
    w1, b1 = init_linear_params(k1, in_features, n_hidden)
    w2, b2 = init_linear_params(k2, n_hidden, n_out)

    spk2, mem2 = fcsnn_forward(x, w1, b1, w2, b2, beta)
    jax.block_until_ready((spk2, mem2))

    # Reference in plain JAX with the same bf16-input / f32-accumulate matmuls.
    cur1 = jnp.dot(x.astype(jnp.bfloat16), w1.astype(jnp.bfloat16),
                   preferred_element_type=jnp.float32) + b1
    spk1_ref = (cur1 > THRESHOLD).astype(jnp.bfloat16)
    cur2 = jnp.dot(spk1_ref, w2.astype(jnp.bfloat16),
                   preferred_element_type=jnp.float32) + b2
    spk2_ref = (cur2 > THRESHOLD).astype(jnp.float32)

    assert spk2.shape == (batch, n_out) and mem2.shape == (batch, n_out)
    assert jnp.allclose(mem2, cur2, atol=1e-3, rtol=1e-3), "mem2 mismatch"
    # Guard the spike comparison against values sitting exactly at threshold.
    safe = jnp.abs(cur2 - THRESHOLD) > 1e-3
    assert jnp.array_equal(jnp.where(safe, spk2, 0.0),
                           jnp.where(safe, spk2_ref, 0.0)), "spk2 mismatch"

    print("KERNEL_OK")
</pallas_src>

<mosaic_0001>
module attributes {stable_mosaic.version = 11 : i64} {
  func.func @fcsnn_kernel(%arg0: i32, %arg1: memref<8x128xbf16, #tpu.memory_space<vmem>>, %arg2: memref<128x128xbf16, #tpu.memory_space<vmem>>, %arg3: memref<1x128xf32, #tpu.memory_space<vmem>>, %arg4: memref<128x128xbf16, #tpu.memory_space<vmem>>, %arg5: memref<1x128xf32, #tpu.memory_space<vmem>>, %arg6: memref<8x128xf32, #tpu.memory_space<vmem>>, %arg7: memref<8x128xf32, #tpu.memory_space<vmem>>) attributes {dimension_semantics = [#tpu.dimension_semantics<parallel>], iteration_bounds = array<i64: 1>, scalar_prefetch = 0 : i64, scratch_operands = 0 : i64, tpu.core_type = #tpu.core_type<tc>, window_params = [{transform_indices = @transform_0, window_bounds = array<i64: 8, 128>}, {pipeline_mode = #tpu.pipeline_mode<synchronous>, transform_indices = @transform_1, window_bounds = array<i64: 128, 128>}, {pipeline_mode = #tpu.pipeline_mode<synchronous>, transform_indices = @transform_2, window_bounds = array<i64: 1, 128>}, {pipeline_mode = #tpu.pipeline_mode<synchronous>, transform_indices = @transform_3, window_bounds = array<i64: 128, 128>}, {pipeline_mode = #tpu.pipeline_mode<synchronous>, transform_indices = @transform_4, window_bounds = array<i64: 1, 128>}, {transform_indices = @transform_5, window_bounds = array<i64: 8, 128>}, {transform_indices = @transform_6, window_bounds = array<i64: 8, 128>}]} {
    %c0 = arith.constant 0 : index
    %c0_0 = arith.constant 0 : index
    %0 = vector.load %arg1[%c0, %c0_0] : memref<8x128xbf16, #tpu.memory_space<vmem>>, vector<8x128xbf16>
    %c0_1 = arith.constant 0 : index
    %c0_2 = arith.constant 0 : index
    %1 = vector.load %arg2[%c0_1, %c0_2] : memref<128x128xbf16, #tpu.memory_space<vmem>>, vector<128x128xbf16>
    %cst = arith.constant dense<0.000000e+00> : vector<8x128xf32>
    %2 = tpu.matmul %0, %1, %cst {dimension_numbers = #tpu.dot_dimension_numbers<[1], [0], [0], [1], [0, 0, 1, 1], [], []>} : vector<8x128xbf16>, vector<128x128xbf16>, vector<8x128xf32> -> vector<8x128xf32>
    %c0_3 = arith.constant 0 : index
    %c0_4 = arith.constant 0 : index
    %3 = vector.load %arg3[%c0_3, %c0_4] : memref<1x128xf32, #tpu.memory_space<vmem>>, vector<1x128xf32>
    %4 = vector.broadcast %3 : vector<1x128xf32> to vector<8x128xf32>
    %5 = arith.addf %2, %4 : vector<8x128xf32>
    %cst_5 = arith.constant 1.000000e+00 : f32
    %6 = vector.broadcast %cst_5 : f32 to vector<8x128xf32>
    %7 = arith.cmpf ogt, %5, %6 : vector<8x128xf32>
    %8 = arith.extui %7 : vector<8x128xi1> to vector<8x128xi32>
    %9 = arith.sitofp %8 : vector<8x128xi32> to vector<8x128xf32>
    %10 = arith.truncf %9 : vector<8x128xf32> to vector<8x128xbf16>
    %c0_6 = arith.constant 0 : index
    %c0_7 = arith.constant 0 : index
    %11 = vector.load %arg4[%c0_6, %c0_7] : memref<128x128xbf16, #tpu.memory_space<vmem>>, vector<128x128xbf16>
    %cst_8 = arith.constant dense<0.000000e+00> : vector<8x128xf32>
    %12 = tpu.matmul %10, %11, %cst_8 {dimension_numbers = #tpu.dot_dimension_numbers<[1], [0], [0], [1], [0, 0, 1, 1], [], []>} : vector<8x128xbf16>, vector<128x128xbf16>, vector<8x128xf32> -> vector<8x128xf32>
    %c0_9 = arith.constant 0 : index
    %c0_10 = arith.constant 0 : index
    %13 = vector.load %arg5[%c0_9, %c0_10] : memref<1x128xf32, #tpu.memory_space<vmem>>, vector<1x128xf32>
    %14 = vector.broadcast %13 : vector<1x128xf32> to vector<8x128xf32>
    %15 = arith.addf %12, %14 : vector<8x128xf32>
    %cst_11 = arith.constant 1.000000e+00 : f32
    %16 = vector.broadcast %cst_11 : f32 to vector<8x128xf32>
    %17 = arith.cmpf ogt, %15, %16 : vector<8x128xf32>
    %18 = arith.extui %17 : vector<8x128xi1> to vector<8x128xi32>
    %19 = arith.sitofp %18 : vector<8x128xi32> to vector<8x128xf32>
    %c0_12 = arith.constant 0 : index
    %c0_13 = arith.constant 0 : index
    %20 = vector.load %arg6[%c0_12, %c0_13] : memref<8x128xf32, #tpu.memory_space<vmem>>, vector<8x128xf32>
    tpu.vector_store %arg6[%c0_12, %c0_13], %19 {strides = array<i32>} : memref<8x128xf32, #tpu.memory_space<vmem>>, vector<8x128xf32>,
    %c0_14 = arith.constant 0 : index
    %c0_15 = arith.constant 0 : index
    %21 = vector.load %arg7[%c0_14, %c0_15] : memref<8x128xf32, #tpu.memory_space<vmem>>, vector<8x128xf32>
    tpu.vector_store %arg7[%c0_14, %c0_15], %15 {strides = array<i32>} : memref<8x128xf32, #tpu.memory_space<vmem>>, vector<8x128xf32>,
    return
  }
  func.func @transform_0(%arg0: i32) -> (i32, i32) {
    %c0_i32 = arith.constant 0 : i32
    %c0_i32_0 = arith.constant 0 : i32
    return %arg0, %c0_i32 : i32, i32
  }
  func.func @transform_1(%arg0: i32) -> (i32, i32) {
    %c0_i32 = arith.constant 0 : i32
    %c0_i32_0 = arith.constant 0 : i32
    %c0_i32_1 = arith.constant 0 : i32
    return %c0_i32, %c0_i32_0 : i32, i32
  }
  func.func @transform_2(%arg0: i32) -> (i32, i32) {
    %c0_i32 = arith.constant 0 : i32
    %c0_i32_0 = arith.constant 0 : i32
    %c0_i32_1 = arith.constant 0 : i32
    return %c0_i32, %c0_i32_0 : i32, i32
  }
  func.func @transform_3(%arg0: i32) -> (i32, i32) {
    %c0_i32 = arith.constant 0 : i32
    %c0_i32_0 = arith.constant 0 : i32
    %c0_i32_1 = arith.constant 0 : i32
    return %c0_i32, %c0_i32_0 : i32, i32
  }
  func.func @transform_4(%arg0: i32) -> (i32, i32) {
    %c0_i32 = arith.constant 0 : i32
    %c0_i32_0 = arith.constant 0 : i32
    %c0_i32_1 = arith.constant 0 : i32
    return %c0_i32, %c0_i32_0 : i32, i32
  }
  func.func @transform_5(%arg0: i32) -> (i32, i32) {
    %c0_i32 = arith.constant 0 : i32
    %c0_i32_0 = arith.constant 0 : i32
    return %arg0, %c0_i32 : i32, i32
  }
  func.func @transform_6(%arg0: i32) -> (i32, i32) {
    %c0_i32 = arith.constant 0 : i32
    %c0_i32_0 = arith.constant 0 : i32
    return %arg0, %c0_i32 : i32, i32
  }
}

</mosaic_0001>

<bundles_post_ra>
// kernel: tpu_custom_call.1
= control target key start
LH: loop header
LB: loop body
LE: loop exit
PB: predicated region body
PF: predicated region fallthrough
CT: control target
= control target key end

     0   :  { %12 = vsyncpa [#allocation3], 0  ;;  %s625_s0 = inlined_call_operand.hbm [shape: bf16[8,128], index: 0, kind: input, shape index: {}]   ;;  %s626_s1 = inlined_call_operand.hbm [shape: bf16[128,128], index: 1, kind: input, shape index: {}]   ;;  %s627_s2 = inlined_call_operand.vmem [shape: f32[1,128], index: 2, kind: input, shape index: {}]   ;;  %s628_s3 = inlined_call_operand.hbm [shape: bf16[128,128], index: 3, kind: input, shape index: {}]   ;;  %s629_s4 = inlined_call_operand.vmem [shape: f32[1,128], index: 4, kind: input, shape index: {}]   ;;  %s630_s5 = inlined_call_operand.hbm [shape: f32[8,128], index: 5, kind: output, shape index: {0}]   ;;  %s631_s6 = inlined_call_operand.hbm [shape: f32[8,128], index: 6, kind: output, shape index: {1}]  }
   0x1   :  { %13 = vsyncpa [#allocation6], 0 }
   0x2   :  { %14 = vsyncpa [#allocation4], 0 }
   0x3   :  { %15 = vsyncpa [#allocation10], 0  ;;  %s540_s21 = smov [#allocation5]  }
   0x4   :  { %s31_s22 = sshll.u32 %s540_s21, 4  ;;  %s32_s22 = int_to_ptr.vmem [resolvable:$true] %s31_s22 }
   0x5   :  { %s440_s23 = scalar_lea.vmem %s32_s22, 1024  ;;  %p445_p1 = scmp.lt.s32.totalorder %s32_s22, %s32_s22 }
   0x6   :  { %p441_p0 = scmp.ne.s32.totalorder %s32_s22, %s440_s23  ;;  %p446_p2 = scmp.lt.s32.totalorder %s440_s23, %s440_s23 }
   0x8   :  { %p447_p3 = por %p446_p2, %p445_p1 }
   0xa   :  { %p448_p4 = pnand %p447_p3, %p441_p0 }
   0xc   :  { %451 = shalt.err (!%p448_p4)
}
   0xd   :  { %s541_s24 = smov 64   ;;  %s542_s25 = smov 4  }
   0xe   :  { %37 = dma.hbm_to_vmem [thread:$0]  %s626_s1, 1024, %s32_s22, [#allocation6], %s541_s24, %s541_s24, %s542_s25  }
   0xf   :  { %s543_s28 = smov [#allocation2]   ;;  %s544_s30 = smov [#allocation7]  }
  0x10   :  { %s22_s29 = sshll.u32 %s543_s28, 4  ;;  %s45_s7 = sshll.u32 %s544_s30, 4  ;;  %s23_s29 = int_to_ptr.vmem [resolvable:$true] %s22_s29  ;;  %s46_s7 = int_to_ptr.vmem [resolvable:$true] %s45_s7 }
  0x11   :  { %s460_s8 = scalar_lea.vmem %s23_s29, 64  ;;  %p465_p6 = scmp.lt.s32.totalorder %s23_s29, %s23_s29 }
  0x12   :  { %p461_p5 = scmp.ne.s32.totalorder %s23_s29, %s460_s8  ;;  %p466_p7 = scmp.lt.s32.totalorder %s460_s8, %s460_s8 }
  0x14   :  { %p467_p8 = por %p466_p7, %p465_p6 }
  0x16   :  { %p468_p9 = pnand %p467_p8, %p461_p5 }
  0x18   :  { %471 = shalt.err (!%p468_p9)
}
  0x19   :  { %25 = dma.hbm_to_vmem [thread:$0]  %s625_s0, 64, %s23_s29, [#allocation3]  }
  0x1a   :  { %s480_s11 = scalar_lea.vmem %s46_s7, 1024  ;;  %p485_p11 = scmp.lt.s32.totalorder %s46_s7, %s46_s7 }
  0x1b   :  { %p481_p10 = scmp.ne.s32.totalorder %s46_s7, %s480_s11  ;;  %p486_p12 = scmp.lt.s32.totalorder %s480_s11, %s480_s11 }
  0x1d   :  { %p487_p13 = por %p486_p12, %p485_p11 }
  0x1f   :  { %p488_p0 = pnand %p487_p13, %p481_p10 }
  0x21   :  { %491 = shalt.err (!%p488_p0)
}
  0x22   :  { %51 = dma.hbm_to_vmem [thread:$0]  %s628_s3, 1024, %s46_s7, [#allocation6], %s541_s24, %s541_s24, %s542_s25  }
  0x23   :  { %532 = dma.done.wait [#allocation3], 64  }
  0x24   :  { %533 = vsyncadd [#allocation3], 4294967232 }
  0x25   :  { %534 = dma.done.wait [#allocation6], 2048  }
  0x26   :  { %535 = vsyncadd [#allocation6], 4294965248  ;;  %v545_v0 = vmov 0.0   ;;  %vm546_vm0 = vmmov 0   ;;  %v416_v1 = vld [vmem:[#allocation5 + $0x38] sm:$0xff]   ;;  %v417_v2 = vld [vmem:[#allocation5 + $0x30] sm:$0xff]  }
  0x27   :  { %366 = vmatprep.subr.bf16.mxu0 %v545_v0  ;;  %382 = vmatprep.mubr.msk.bf16.mxu0 %vm546_vm0, %v545_v0  ;;  %v418_v3 = vld [vmem:[#allocation5 + $0x28] sm:$0xff]   ;;  %v424_v4 = vld [vmem:[#allocation7 + $0x38] sm:$0xff]   ;;  %v419_v5 = vld [vmem:[#allocation5 + $0x20] sm:$0xff]   ;;  %v547_v23 = vmov 1.0|1.0   ;;  %s548_s15 = smov [#allocation9]  }
  0x28   :  { %386 = vmatprep.subr.bf16.mxu1 %v545_v0  ;;  %402 = vmatprep.mubr.msk.bf16.mxu1 %vm546_vm0, %v545_v0  ;;  %v425_v6 = vld [vmem:[#allocation7 + $0x30] sm:$0xff]   ;;  %v420_v7 = vld [vmem:[#allocation5 + $0x18] sm:$0xff]   ;;  %v426_v8 = vld [vmem:[#allocation7 + $0x28] sm:$0xff]   ;;  %s312_s16 = sshll.u32 %s548_s15, 4  ;;  %s549_s17 = smov [#allocation8]   ;;  %s313_s16 = int_to_ptr.vmem [resolvable:$true] %s312_s16 }
  0x29   :  { %367 = vmatpush3.bf16.msra.mxu0 %v416_v1  ;;  %387 = vmatpush3.bf16.msra.mxu1 %v424_v4  ;;  %v421_v9 = vld [vmem:[#allocation5 + $0x10] sm:$0xff]   ;;  %v427_v10 = vld [vmem:[#allocation7 + $0x20] sm:$0xff]   ;;  %v422_v11 = vld [vmem:[#allocation5 + $0x8] sm:$0xff]   ;;  %s302_s18 = sshll.u32 %s549_s17, 4  ;;  %p497_p2 = scmp.lt.s32.totalorder %s313_s16, %s313_s16  ;;  %s303_s18 = int_to_ptr.vmem [resolvable:$true] %s302_s18 }
  0x2a   :  { %368 = vmatprep.subr.bf16.mxu0 %v545_v0  ;;  %388 = vmatprep.subr.bf16.mxu1 %v545_v0  ;;  %v428_v12 = vld [vmem:[#allocation7 + $0x18] sm:$0xff]   ;;  %v423_v13 = vld [vmem:[#allocation5] sm:$0xff]   ;;  %v429_v14 = vld [vmem:[#allocation7 + $0x10] sm:$0xff]  }
  0x2b   :  { %v64_v15 = vld [vmem:[#allocation2] sm:$0xf]  ;;  %v430_v16 = vld [vmem:[#allocation7 + $0x8] sm:$0xff]   ;;  %v431_v17 = vld [vmem:[#allocation7] sm:$0xff]  }
  0x2c   :  { %v326_v18 = vld [vmem:[%s627_s2] ss:$0 sm:$0xff]  ;;  %s492_s2 = scalar_lea.vmem %s313_s16, 128 }
  0x2d   :  { %369 = vmatpush3.bf16.msra.mxu0 %v417_v2  ;;  %389 = vmatpush3.bf16.msra.mxu1 %v425_v6  ;;  %v336_v25 = vld [vmem:[%s629_s4] ss:$0 sm:$0xff]  ;;  %p493_p1 = scmp.ne.s32.totalorder %s313_s16, %s492_s2  ;;  %p498_p3 = scmp.lt.s32.totalorder %s492_s2, %s492_s2 }
  0x2e   :  { %370 = vmatprep.subr.bf16.mxu0 %v545_v0  ;;  %390 = vmatprep.subr.bf16.mxu1 %v545_v0 }
  0x2f   :  { %p499_p4 = por %p498_p3, %p497_p2 }
  0x31   :  { %371 = vmatpush3.bf16.msra.mxu0 %v418_v3  ;;  %391 = vmatpush3.bf16.msra.mxu1 %v426_v8  ;;  %p500_p5 = pnand %p499_p4, %p493_p1 }
  0x32   :  { %372 = vmatprep.subr.bf16.mxu0 %v545_v0  ;;  %392 = vmatprep.subr.bf16.mxu1 %v545_v0 }
  0x35   :  { %373 = vmatpush3.bf16.msra.mxu0 %v419_v5  ;;  %393 = vmatpush3.bf16.msra.mxu1 %v427_v10 }
  0x36   :  { %374 = vmatprep.subr.bf16.mxu0 %v545_v0  ;;  %394 = vmatprep.subr.bf16.mxu1 %v545_v0 }
  0x39   :  { %375 = vmatpush3.bf16.msra.mxu0 %v420_v7  ;;  %395 = vmatpush3.bf16.msra.mxu1 %v428_v12 }
  0x3a   :  { %376 = vmatprep.subr.bf16.mxu0 %v545_v0  ;;  %396 = vmatprep.subr.bf16.mxu1 %v545_v0 }
  0x3d   :  { %377 = vmatpush3.bf16.msra.mxu0 %v421_v9  ;;  %397 = vmatpush3.bf16.msra.mxu1 %v429_v14 }
  0x3e   :  { %378 = vmatprep.subr.bf16.mxu0 %v545_v0  ;;  %398 = vmatprep.subr.bf16.mxu1 %v545_v0 }
  0x41   :  { %379 = vmatpush3.bf16.msra.mxu0 %v422_v11  ;;  %399 = vmatpush3.bf16.msra.mxu1 %v430_v16 }
  0x42   :  { %380 = vmatprep.subr.bf16.mxu0 %v545_v0  ;;  %400 = vmatprep.subr.bf16.mxu1 %v545_v0 }
  0x45   :  { %381 = vmatpush3.bf16.msra.mxu0 %v423_v13  ;;  %401 = vmatpush3.bf16.msra.mxu1 %v431_v17 }
  0x48   :  { %383 = vmatmul.mubr.bf16.vlgmr.msra.gmra.mxu0 %v64_v15 }
 0x108   :  { %v170_v19 = vpop.f32.mrf.mxu0 }
 0x109   :  { %v171_v20 = vadd.f32 %v326_v18, %v170_v19 }
 0x10a   :  { %v384_v21 = vpop.f32.mrf.mxu0 }
 0x10b   :  { %vm176_vm1 = vcmp.gt.f32.partialorder %v171_v20, 1.0 }
 0x10c   :  { %vm345_vm2 = vmpackc.low %vm176_vm1, %vm176_vm1  ;;  %v173_v22 = vpop.f32.mrf.mxu0 }
 0x10d   :  { %403 = vmatmul.mubr.msk.bf16.vlgmr.msra.gmra.mxu1 %vm345_vm2, %v547_v23 }
 0x10e   :  { %v385_v24 = vpop.f32.mrf.mxu0 }
 0x1cd   :  { %v285_v26 = vpop.f32.mrf.mxu1 }
 0x1ce   :  { %v286_v27 = vadd.f32 %v336_v25, %v285_v26 }
 0x1cf   :  { %v404_v28 = vpop.f32.mrf.mxu1 }
 0x1d0   :  { %vm291_vm3 = vcmp.gt.f32.partialorder %v286_v27, 1.0  ;;  %295 = vst [vmem:[#allocation9] sm:$0xff] %v286_v27 }
 0x1d1   :  { %v288_v29 = vpop.f32.mrf.mxu1  ;;  %v347_v30 = vsel %vm291_vm3, 1.0, %v545_v0 }
 0x1d2   :  { %503 = shalt.err (!%p500_p5)
}
 0x1d3   :  { %315 = dma.vmem_to_hbm [thread:$0]  %s313_s16, 128, %s631_s6, [#allocation10]   ;;  %294 = vst [vmem:[#allocation8] sm:$0xff] %v347_v30  ;;  %v405_v31 = vpop.f32.mrf.mxu1 }
 0x1d4   :  { %s512_s20 = scalar_lea.vmem %s303_s18, 128  ;;  %p517_p7 = scmp.lt.s32.totalorder %s303_s18, %s303_s18 }
 0x1d5   :  { %p513_p6 = scmp.ne.s32.totalorder %s303_s18, %s512_s20  ;;  %p518_p8 = scmp.lt.s32.totalorder %s512_s20, %s512_s20 }
 0x1d7   :  { %p519_p9 = por %p518_p8, %p517_p7 }
 0x1d9   :  { %p520_p10 = pnand %p519_p9, %p513_p6 }
 0x1db   :  { %523 = shalt.err (!%p520_p10)
}
 0x1dc   :  { %305 = dma.vmem_to_hbm [thread:$0]  %s303_s18, 128, %s630_s5, [#allocation4]  }
 0x1dd   :  { %536 = dma.done.wait [#allocation4], 128  }
 0x1de   :  { %537 = vsyncadd [#allocation4], 4294967168 }
 0x1df   :  { %538 = dma.done.wait [#allocation10], 128  }
 0x1e0   :  { %539 = vsyncadd [#allocation10], 4294967168 }
 0x1e1   :  { %322 = vsyncpa [#allocation3], 1 }
 0x1e2   :  { %323 = vsyncpa [#allocation6], 1 }
 0x1e3   :  { %324 = vsyncpa [#allocation4], 1 }
 0x1e4   :  { %325 = vsyncpa [#allocation10], 1 }

</bundles_post_ra>
